<compile_context>
chip_gen: v6e
topology: v6e:2x2x1
jax: 0.10.0
libtpu: 0.0.40
codegen_flags: <defaults>
</compile_context>

<pallas_src>
import jax
import jax.numpy as jnp
from jax.experimental import pallas as pl
from jax.experimental.pallas import tpu as pltpu

EPS = 1e-5
N_PAD = 128          # lane-dense padded logits width (real classes = 10)


def mlp_kernel(x_ref, w1_ref, b1_ref, w2_ref, b2_ref, out_ref):
    # x arrives as f32 (read from HBM exactly once); cast to bf16 in-register
    # for the MXU.  linear1 has BN already folded into w1/b1.
    x = x_ref[...].astype(jnp.bfloat16)
    h = jnp.dot(x, w1_ref[...], preferred_element_type=jnp.float32)
    h = jnp.maximum(h + b1_ref[...], 0.0)             # bias + ReLU in f32
    # Dropout in eval mode is identity.
    # linear2 on the 128-wide padded output (columns 10..127 are zero).
    out = jnp.dot(h.astype(jnp.bfloat16), w2_ref[...],
                  preferred_element_type=jnp.float32)
    out_ref[...] = out + b2_ref[...]


def _round_up(n, m):
    return ((n + m - 1) // m) * m


def _tpu_config():
    """(max_tile, vmem_limit_bytes) per TPU generation."""
    try:
        kind = jax.devices()[0].device_kind.lower()
    except Exception:
        kind = ""
    if ("v5" in kind) or ("v6" in kind):
        # 128 MiB physical VMEM: big tiles amortize per-step overhead.
        return 2048, 96 * 1024 * 1024
    # v7x (64 MiB per-TC VMEM) or unknown: stay conservative.
    return 1024, 48 * 1024 * 1024


def _choose_batch_tiling(B, max_tile):
    """Pick (TB, Bp): batch tile (multiple of 8 for f32) and padded batch.

    Prefers (a) a tile that divides B exactly (no materialized jnp.pad of x)
    and (b) >= 2 grid steps so dimension_semantics=("parallel",) can shard
    across both TensorCores on v7x.
    """
    if B <= 8:
        return 8, _round_up(B, 8)
    # Target: at most half the batch (>= 2 grid steps), capped by max_tile.
    target = max(8, min(max_tile, _round_up(-(-B // 2), 8)))
    # Largest multiple of 8 <= target that divides B exactly -> no padding.
    tb = (target // 8) * 8
    while tb >= 8:
        if B % tb == 0:
            return tb, B
        tb -= 8
    # Fallback: pad the batch up to a multiple of the target tile.
    return target, _round_up(B, target)


def mlp_forward_pallas(x_flat, params, max_tile=None, vmem_limit=None):
    """x_flat: (B, 3072) float32. Returns logits (B, 10) float32."""
    B, K = x_flat.shape
    H = params["w1"].shape[1]
    C = params["w2"].shape[1]

    cfg_tile, cfg_vmem = _tpu_config()
    if max_tile is None:
        max_tile = cfg_tile
    if vmem_limit is None:
        vmem_limit = cfg_vmem

    # ---- glue-side (static) preprocessing on the tiny weight tensors ----
    # Fold eval-mode BatchNorm into linear1: y = (x@w1 + b1 - rmean)*scale + beta
    scale = params["gamma"] * jax.lax.rsqrt(params["rvar"] + EPS)        # (1, H)
    w1f = (params["w1"] * scale).astype(jnp.bfloat16)                    # (K, H)
    b1f = (params["b1"] - params["rmean"]) * scale + params["beta"]      # (1, H) f32
    # Pad linear2 to a lane-dense 128-wide output.
    w2p = jnp.zeros((H, N_PAD), jnp.bfloat16).at[:, :C].set(
        params["w2"].astype(jnp.bfloat16))
    b2p = jnp.zeros((1, N_PAD), jnp.float32).at[:, :C].set(params["b2"])

    # Batch tiling: x stays f32 (cast happens inside the kernel).
    TB, Bp = _choose_batch_tiling(B, max_tile)
    xf = x_flat
    if Bp != B:
        xf = jnp.pad(xf, ((0, Bp - B), (0, 0)))   # fallback path only

    grid = (Bp // TB,)
    cost = pl.CostEstimate(
        flops=2 * Bp * (K * H + H * N_PAD),
        transcendentals=0,
        bytes_accessed=(Bp * K * 4            # x (f32, read once)
                        + K * H * 2           # folded w1 (bf16)
                        + H * N_PAD * 2       # padded w2 (bf16)
                        + (H + N_PAD) * 4     # biases
                        + Bp * N_PAD * 4))    # logits out (f32)

    logits_padded = pl.pallas_call(
        mlp_kernel,
        out_shape=jax.ShapeDtypeStruct((Bp, N_PAD), jnp.float32),
        grid=grid,
        in_specs=[
            pl.BlockSpec((TB, K), lambda i: (i, 0)),        # x tile (f32)
            pl.BlockSpec((K, H), lambda i: (0, 0)),         # folded w1 (resident)
            pl.BlockSpec((1, H), lambda i: (0, 0)),         # folded b1
            pl.BlockSpec((H, N_PAD), lambda i: (0, 0)),     # padded w2
            pl.BlockSpec((1, N_PAD), lambda i: (0, 0)),     # padded b2
        ],
        out_specs=pl.BlockSpec((TB, N_PAD), lambda i: (i, 0)),
        compiler_params=pltpu.CompilerParams(
            dimension_semantics=("parallel",),
            vmem_limit_bytes=vmem_limit),
        cost_estimate=cost,
    )(xf, w1f, b1f, w2p, b2p)

    return logits_padded[:B, :C]


def model_forward(x_nchw, params, y=None):
    B = x_nchw.shape[0]
    x_flat = x_nchw.reshape(B, -1).astype(jnp.float32)   # x.view(x.size(0), -1)
    logits = mlp_forward_pallas(x_flat, params)
    pred = jnp.argmax(logits, axis=1)
    if y is None:
        return pred
    # CrossEntropyLoss (mean over batch) on logits
    logp = jax.nn.log_softmax(logits, axis=-1)
    loss = -jnp.mean(jnp.take_along_axis(logp, y[:, None], axis=1))
    acc = jnp.mean((pred.astype(jnp.int32) == y.astype(jnp.int32)).astype(jnp.float32))
    return loss, acc


def init_params(key, hidden_size=128, in_features=3072, num_classes=10):
    k1, k2, k3, k4 = jax.random.split(key, 4)
    bound1 = 1.0 / jnp.sqrt(in_features)
    bound2 = 1.0 / jnp.sqrt(hidden_size)
    return {
        # nn.Linear(3072, hidden): torch weight (H, 3072); stored transposed (3072, H)
        "w1": jax.random.uniform(k1, (in_features, hidden_size), jnp.float32, -bound1, bound1),
        "b1": jax.random.uniform(k2, (1, hidden_size), jnp.float32, -bound1, bound1),
        # BatchNorm1d(hidden) params / buffers as in __init__
        "gamma": jnp.ones((1, hidden_size), jnp.float32),
        "beta": jnp.zeros((1, hidden_size), jnp.float32),
        "rmean": jnp.zeros((1, hidden_size), jnp.float32),
        "rvar": jnp.ones((1, hidden_size), jnp.float32),
        # nn.Linear(hidden, 10)
        "w2": jax.random.uniform(k3, (hidden_size, num_classes), jnp.float32, -bound2, bound2),
        "b2": jax.random.uniform(k4, (1, num_classes), jnp.float32, -bound2, bound2),
    }


if __name__ == "__main__":
    key = jax.random.PRNGKey(0)
    kx, ky, kp = jax.random.split(key, 3)

    B, hidden = 8, 128
    x = jax.random.normal(kx, (B, 3, 32, 32), jnp.float32)   # NCHW, 3*32*32 = 3072
    y = jax.random.randint(ky, (B,), 0, 10, jnp.int32)
    params = init_params(kp, hidden_size=hidden)

    # y is None -> predictions
    pred = model_forward(x, params, y=None)
    jax.block_until_ready(pred)

    # y provided -> (loss, acc)
    loss, acc = model_forward(x, params, y=y)
    jax.block_until_ready((loss, acc))

    # --- references ---
    def ref_logits_f32(x_nchw, p):
        xf = x_nchw.reshape(x_nchw.shape[0], -1)
        h = xf @ p["w1"] + p["b1"]
        h = p["gamma"] * (h - p["rmean"]) / jnp.sqrt(p["rvar"] + EPS) + p["beta"]
        h = jnp.maximum(h, 0.0)
        return h @ p["w2"] + p["b2"]

    def ref_logits_bf16(x_nchw, p):
        # Same bf16-storage / f32-accumulate recipe as the kernel.
        xf = x_nchw.reshape(x_nchw.shape[0], -1)
        scale = p["gamma"] * jax.lax.rsqrt(p["rvar"] + EPS)
        w1f = (p["w1"] * scale).astype(jnp.bfloat16)
        b1f = (p["b1"] - p["rmean"]) * scale + p["beta"]
        h = jnp.dot(xf.astype(jnp.bfloat16), w1f,
                    preferred_element_type=jnp.float32) + b1f
        h = jnp.maximum(h, 0.0)
        return jnp.dot(h.astype(jnp.bfloat16), p["w2"].astype(jnp.bfloat16),
                       preferred_element_type=jnp.float32) + p["b2"]

    got = mlp_forward_pallas(x.reshape(B, -1), params)
    jax.block_until_ready(got)

    # Tight check vs a numerically-equivalent (bf16 weights, f32 accum) reference.
    ref_b = ref_logits_bf16(x, params)
    assert jnp.allclose(ref_b, got, atol=2e-3, rtol=2e-3), "mismatch vs bf16 reference"
    # Loose check vs the full-f32 PyTorch-equivalent math (bf16 storage noise).
    ref_f = ref_logits_f32(x, params)
    assert jnp.allclose(ref_f, got, atol=5e-2, rtol=5e-2), "mismatch vs f32 reference"

    # TODO(synk): training-mode BatchNorm running-stat update and RNG Dropout are
    # not implemented (module is exercised in eval/inference mode).
    print("KERNEL_OK")
</pallas_src>

<mosaic_0001>
module attributes {stable_mosaic.version = 11 : i64} {
  func.func @mlp_kernel(%arg0: i32, %arg1: memref<8x3072xf32, #tpu.memory_space<vmem>>, %arg2: memref<3072x128xbf16, #tpu.memory_space<vmem>>, %arg3: memref<1x128xf32, #tpu.memory_space<vmem>>, %arg4: memref<128x128xbf16, #tpu.memory_space<vmem>>, %arg5: memref<1x128xf32, #tpu.memory_space<vmem>>, %arg6: memref<8x128xf32, #tpu.memory_space<vmem>>) attributes {dimension_semantics = [#tpu.dimension_semantics<parallel>], iteration_bounds = array<i64: 1>, scalar_prefetch = 0 : i64, scratch_operands = 0 : i64, tpu.core_type = #tpu.core_type<tc>, window_params = [{transform_indices = @transform_0, window_bounds = array<i64: 8, 3072>}, {pipeline_mode = #tpu.pipeline_mode<synchronous>, transform_indices = @transform_1, window_bounds = array<i64: 3072, 128>}, {pipeline_mode = #tpu.pipeline_mode<synchronous>, transform_indices = @transform_2, window_bounds = array<i64: 1, 128>}, {pipeline_mode = #tpu.pipeline_mode<synchronous>, transform_indices = @transform_3, window_bounds = array<i64: 128, 128>}, {pipeline_mode = #tpu.pipeline_mode<synchronous>, transform_indices = @transform_4, window_bounds = array<i64: 1, 128>}, {transform_indices = @transform_5, window_bounds = array<i64: 8, 128>}]} {
    %c0 = arith.constant 0 : index
    %c0_0 = arith.constant 0 : index
    %0 = vector.load %arg1[%c0, %c0_0] : memref<8x3072xf32, #tpu.memory_space<vmem>>, vector<8x3072xf32>
    %1 = arith.truncf %0 : vector<8x3072xf32> to vector<8x3072xbf16>
    %c0_1 = arith.constant 0 : index
    %c0_2 = arith.constant 0 : index
    %2 = vector.load %arg2[%c0_1, %c0_2] : memref<3072x128xbf16, #tpu.memory_space<vmem>>, vector<3072x128xbf16>
    %cst = arith.constant dense<0.000000e+00> : vector<8x128xf32>
    %3 = tpu.matmul %1, %2, %cst {dimension_numbers = #tpu.dot_dimension_numbers<[1], [0], [0], [1], [0, 0, 1, 1], [], []>} : vector<8x3072xbf16>, vector<3072x128xbf16>, vector<8x128xf32> -> vector<8x128xf32>
    %c0_3 = arith.constant 0 : index
    %c0_4 = arith.constant 0 : index
    %4 = vector.load %arg3[%c0_3, %c0_4] : memref<1x128xf32, #tpu.memory_space<vmem>>, vector<1x128xf32>
    %5 = vector.broadcast %4 : vector<1x128xf32> to vector<8x128xf32>
    %6 = arith.addf %3, %5 : vector<8x128xf32>
    %cst_5 = arith.constant 0.000000e+00 : f32
    %7 = vector.broadcast %cst_5 : f32 to vector<8x128xf32>
    %8 = arith.maximumf %6, %7 : vector<8x128xf32>
    %9 = arith.truncf %8 : vector<8x128xf32> to vector<8x128xbf16>
    %c0_6 = arith.constant 0 : index
    %c0_7 = arith.constant 0 : index
    %10 = vector.load %arg4[%c0_6, %c0_7] : memref<128x128xbf16, #tpu.memory_space<vmem>>, vector<128x128xbf16>
    %cst_8 = arith.constant dense<0.000000e+00> : vector<8x128xf32>
    %11 = tpu.matmul %9, %10, %cst_8 {dimension_numbers = #tpu.dot_dimension_numbers<[1], [0], [0], [1], [0, 0, 1, 1], [], []>} : vector<8x128xbf16>, vector<128x128xbf16>, vector<8x128xf32> -> vector<8x128xf32>
    %c0_9 = arith.constant 0 : index
    %c0_10 = arith.constant 0 : index
    %12 = vector.load %arg5[%c0_9, %c0_10] : memref<1x128xf32, #tpu.memory_space<vmem>>, vector<1x128xf32>
    %13 = vector.broadcast %12 : vector<1x128xf32> to vector<8x128xf32>
    %14 = arith.addf %11, %13 : vector<8x128xf32>
    %c0_11 = arith.constant 0 : index
    %c0_12 = arith.constant 0 : index
    %15 = vector.load %arg6[%c0_11, %c0_12] : memref<8x128xf32, #tpu.memory_space<vmem>>, vector<8x128xf32>
    tpu.vector_store %arg6[%c0_11, %c0_12], %14 {strides = array<i32>} : memref<8x128xf32, #tpu.memory_space<vmem>>, vector<8x128xf32>,
    return
  }
  func.func @transform_0(%arg0: i32) -> (i32, i32) {
    %c0_i32 = arith.constant 0 : i32
    %c0_i32_0 = arith.constant 0 : i32
    return %arg0, %c0_i32 : i32, i32
  }
  func.func @transform_1(%arg0: i32) -> (i32, i32) {
    %c0_i32 = arith.constant 0 : i32
    %c0_i32_0 = arith.constant 0 : i32
    %c0_i32_1 = arith.constant 0 : i32
    return %c0_i32, %c0_i32_0 : i32, i32
  }
  func.func @transform_2(%arg0: i32) -> (i32, i32) {
    %c0_i32 = arith.constant 0 : i32
    %c0_i32_0 = arith.constant 0 : i32
    %c0_i32_1 = arith.constant 0 : i32
    return %c0_i32, %c0_i32_0 : i32, i32
  }
  func.func @transform_3(%arg0: i32) -> (i32, i32) {
    %c0_i32 = arith.constant 0 : i32
    %c0_i32_0 = arith.constant 0 : i32
    %c0_i32_1 = arith.constant 0 : i32
    return %c0_i32, %c0_i32_0 : i32, i32
  }
  func.func @transform_4(%arg0: i32) -> (i32, i32) {
    %c0_i32 = arith.constant 0 : i32
    %c0_i32_0 = arith.constant 0 : i32
    %c0_i32_1 = arith.constant 0 : i32
    return %c0_i32, %c0_i32_0 : i32, i32
  }
  func.func @transform_5(%arg0: i32) -> (i32, i32) {
    %c0_i32 = arith.constant 0 : i32
    %c0_i32_0 = arith.constant 0 : i32
    return %arg0, %c0_i32 : i32, i32
  }
}

</mosaic_0001>

<bundles_post_ra>
// kernel: tpu_custom_call.1
= control target key start
LH: loop header
LB: loop body
LE: loop exit
PB: predicated region body
PF: predicated region fallthrough
CT: control target
= control target key end

     0   :  { %10 = vsyncpa [#allocation3], 0  ;;  %s3107_s0 = inlined_call_operand.hbm [shape: f32[8,3072], index: 0, kind: input, shape index: {}]   ;;  %s3108_s1 = inlined_call_operand.hbm [shape: bf16[3072,128], index: 1, kind: input, shape index: {}]   ;;  %s3109_s2 = inlined_call_operand.vmem [shape: f32[1,128], index: 2, kind: input, shape index: {}]   ;;  %s3110_s3 = inlined_call_operand.hbm [shape: bf16[128,128], index: 3, kind: input, shape index: {}]   ;;  %s3111_s4 = inlined_call_operand.vmem [shape: f32[1,128], index: 4, kind: input, shape index: {}]   ;;  %s3112_s5 = inlined_call_operand.hbm [shape: f32[8,128], index: 5, kind: output, shape index: {}]  }
   0x1   :  { %11 = vsyncpa [#allocation6], 0 }
   0x2   :  { %12 = vsyncpa [#allocation4], 0  ;;  %s3051_s18 = smov [#allocation5]  }
   0x3   :  { %s28_s19 = sshll.u32 %s3051_s18, 4  ;;  %s29_s19 = int_to_ptr.vmem [resolvable:$true] %s28_s19 }
   0x4   :  { %s2973_s20 = scalar_lea.vmem %s29_s19, 24576  ;;  %p2978_p1 = scmp.lt.s32.totalorder %s29_s19, %s29_s19 }
   0x5   :  { %p2974_p0 = scmp.ne.s32.totalorder %s29_s19, %s2973_s20  ;;  %p2979_p2 = scmp.lt.s32.totalorder %s2973_s20, %s2973_s20 }
   0x7   :  { %p2980_p3 = por %p2979_p2, %p2978_p1 }
   0x9   :  { %p2981_p4 = pnand %p2980_p3, %p2974_p0 }
   0xb   :  { %2984 = shalt.err (!%p2981_p4)
}
   0xc   :  { %s3052_s21 = smov 64   ;;  %s3053_s22 = smov 4  }
   0xd   :  { %34 = dma.hbm_to_vmem [thread:$0]  %s3108_s1, 24576, %s29_s19, [#allocation6], %s3052_s21, %s3052_s21, %s3053_s22  }
   0xe   :  { %s3054_s25 = smov [#allocation2]   ;;  %s3055_s27 = smov [#allocation7]  }
   0xf   :  { %s19_s26 = sshll.u32 %s3054_s25, 4  ;;  %s42_s28 = sshll.u32 %s3055_s27, 4  ;;  %s20_s26 = int_to_ptr.vmem [resolvable:$true] %s19_s26  ;;  %s43_s28 = int_to_ptr.vmem [resolvable:$true] %s42_s28 }
  0x10   :  { %s2993_s29 = scalar_lea.vmem %s20_s26, 3072  ;;  %p2998_p6 = scmp.lt.s32.totalorder %s20_s26, %s20_s26 }
  0x11   :  { %p2994_p5 = scmp.ne.s32.totalorder %s20_s26, %s2993_s29  ;;  %p2999_p7 = scmp.lt.s32.totalorder %s2993_s29, %s2993_s29 }
  0x13   :  { %p3000_p8 = por %p2999_p7, %p2998_p6 }
  0x15   :  { %p3001_p9 = pnand %p3000_p8, %p2994_p5 }
  0x17   :  { %3004 = shalt.err (!%p3001_p9)
}
  0x18   :  { %22 = dma.hbm_to_vmem [thread:$0]  %s3107_s0, 3072, %s20_s26, [#allocation3]  }
  0x19   :  { %s3013_s7 = scalar_lea.vmem %s43_s28, 1024  ;;  %p3018_p11 = scmp.lt.s32.totalorder %s43_s28, %s43_s28 }
  0x1a   :  { %p3014_p10 = scmp.ne.s32.totalorder %s43_s28, %s3013_s7  ;;  %p3019_p12 = scmp.lt.s32.totalorder %s3013_s7, %s3013_s7 }
  0x1c   :  { %p3020_p13 = por %p3019_p12, %p3018_p11 }
  0x1e   :  { %p3021_p0 = pnand %p3020_p13, %p3014_p10 }
  0x20   :  { %3024 = shalt.err (!%p3021_p0)
}
  0x21   :  { %48 = dma.hbm_to_vmem [thread:$0]  %s3110_s3, 1024, %s43_s28, [#allocation6], %s3052_s21, %s3052_s21, %s3053_s22  }
  0x22   :  { %3045 = dma.done.wait [#allocation3], 3072  }
  0x23   :  { %3046 = vsyncadd [#allocation3], 4294964224 }
  0x24   :  { %3047 = dma.done.wait [#allocation6], 25600  }
  0x25   :  { %3048 = vsyncadd [#allocation6], 4294941696  ;;  %v2765_v0 = vld [vmem:[#allocation5 + $0x78] sm:$0xff]   ;;  %v2769_v4 = vld [vmem:[#allocation5 + $0x70] sm:$0xff]   ;;  %vm3057_vm0 = vmmov 0   ;;  %s3058_s10 = smov [#allocation8]  }
  0x26   :  { %v2766_v1 = vld [vmem:[#allocation5 + $0xf8] sm:$0xff]   ;;  %2464 = vmatprep.subr.bf16.mxu0 %v2765_v0  ;;  %v2770_v5 = vld [vmem:[#allocation5 + $0xf0] sm:$0xff]   ;;  %v2773_v8 = vld [vmem:[#allocation5 + $0x68] sm:$0xff]   ;;  %s2252_s11 = sshll.u32 %s3058_s10, 4  ;;  %s2253_s11 = int_to_ptr.vmem [resolvable:$true] %s2252_s11 }
  0x27   :  { %v2767_v2 = vld [vmem:[#allocation5 + $0x38] sm:$0xff]   ;;  %2486 = vmatprep.subr.bf16.mxu1 %v2766_v1  ;;  %v2771_v6 = vld [vmem:[#allocation5 + $0x30] sm:$0xff]   ;;  %v2774_v9 = vld [vmem:[#allocation5 + $0xe8] sm:$0xff]   ;;  %s3025_s12 = scalar_lea.vmem %s2253_s11, 128  ;;  %p3030_p2 = scmp.lt.s32.totalorder %s2253_s11, %s2253_s11 }
  0x28   :  { %v2768_v3 = vld [vmem:[#allocation5 + $0xb8] sm:$0xff]   ;;  %2465 = vmatpush3.bf16.msra.mxu0 %v2767_v2  ;;  %v2772_v7 = vld [vmem:[#allocation5 + $0xb0] sm:$0xff]   ;;  %v2775_v10 = vld [vmem:[#allocation5 + $0x28] sm:$0xff]   ;;  %p3026_p1 = scmp.ne.s32.totalorder %s2253_s11, %s3025_s12  ;;  %p3031_p3 = scmp.lt.s32.totalorder %s3025_s12, %s3025_s12 }
  0x29   :  { %2487 = vmatpush3.bf16.msra.mxu1 %v2768_v3  ;;  %2466 = vmatprep.subr.bf16.mxu0 %v2769_v4  ;;  %v2776_v11 = vld [vmem:[#allocation5 + $0xa8] sm:$0xff]   ;;  %v2777_v12 = vld [vmem:[#allocation5 + $0x60] sm:$0xff]   ;;  %v2781_v16 = vld [vmem:[#allocation5 + $0x58] sm:$0xff]  }
  0x2a   :  { %2488 = vmatprep.subr.bf16.mxu1 %v2770_v5  ;;  %v2778_v13 = vld [vmem:[#allocation5 + $0xe0] sm:$0xff]   ;;  %v2782_v17 = vld [vmem:[#allocation5 + $0xd8] sm:$0xff]   ;;  %v2785_v20 = vld [vmem:[#allocation5 + $0x50] sm:$0xff]   ;;  %p3032_p4 = por %p3031_p3, %p3030_p2 }
  0x2b   :  { %v2779_v14 = vld [vmem:[#allocation5 + $0x20] sm:$0xff]   ;;  %v2783_v18 = vld [vmem:[#allocation5 + $0x18] sm:$0xff]   ;;  %v2786_v21 = vld [vmem:[#allocation5 + $0xd0] sm:$0xff]  }
  0x2c   :  { %2467 = vmatpush3.bf16.msra.mxu0 %v2771_v6  ;;  %v2780_v15 = vld [vmem:[#allocation5 + $0xa0] sm:$0xff]   ;;  %v2784_v19 = vld [vmem:[#allocation5 + $0x98] sm:$0xff]   ;;  %v2787_v22 = vld [vmem:[#allocation5 + $0x10] sm:$0xff]   ;;  %p3033_p5 = pnand %p3032_p4, %p3026_p1 }
  0x2d   :  { %2489 = vmatpush3.bf16.msra.mxu1 %v2772_v7  ;;  %2468 = vmatprep.subr.bf16.mxu0 %v2773_v8  ;;  %v2788_v23 = vld [vmem:[#allocation5 + $0x90] sm:$0xff]   ;;  %v2789_v24 = vld [vmem:[#allocation5 + $0x48] sm:$0xff]   ;;  %v2793_v28 = vld [vmem:[#allocation5 + $0x40] sm:$0xff]  }
  0x2e   :  { %2490 = vmatprep.subr.bf16.mxu1 %v2774_v9  ;;  %v2790_v25 = vld [vmem:[#allocation5 + $0xc8] sm:$0xff]   ;;  %v2794_v29 = vld [vmem:[#allocation5 + $0xc0] sm:$0xff]   ;;  %v64_v33 = vld [vmem:[#allocation2 + $0x18] sm:$0xff] }
  0x2f   :  { %v2791_v26 = vld [vmem:[#allocation5 + $0x8] sm:$0xff]   ;;  %v2795_v30 = vld [vmem:[#allocation5] sm:$0xff]   ;;  %v88_v36 = vpack.c.bf16 %v64_v33, %v64_v33  ;;  %v63_v38 = vld [vmem:[#allocation2 + $0x10] sm:$0xff] }
  0x30   :  { %2469 = vmatpush3.bf16.msra.mxu0 %v2775_v10  ;;  %v2792_v27 = vld [vmem:[#allocation5 + $0x88] sm:$0xff]   ;;  %v2796_v31 = vld [vmem:[#allocation5 + $0x80] sm:$0xff]   ;;  %v87_v39 = vpack.c.bf16 %v63_v38, %v63_v38  ;;  %v2797_v40 = vld [vmem:[#allocation5 + $0x178] sm:$0xff]  }
  0x31   :  { %2491 = vmatpush3.bf16.msra.mxu1 %v2776_v11  ;;  %2470 = vmatprep.subr.bf16.mxu0 %v2777_v12  ;;  %v62_v32 = vld [vmem:[#allocation2 + $0x8] sm:$0xff]  ;;  %v61_v34 = vld [vmem:[#allocation2] sm:$0xff]  ;;  %v2798_v41 = vld [vmem:[#allocation5 + $0x1f8] sm:$0xff]  }
  0x32   :  { %2492 = vmatprep.subr.bf16.mxu1 %v2778_v13  ;;  %v86_v35 = vpack.c.bf16 %v62_v32, %v62_v32  ;;  %v85_v37 = vpack.c.bf16 %v61_v34, %v61_v34  ;;  %1724 = vmatprep.mubr.bf16.mxu1 %v88_v36  ;;  %v2799_v42 = vld [vmem:[#allocation5 + $0x138] sm:$0xff]   ;;  %v2801_v44 = vld [vmem:[#allocation5 + $0x170] sm:$0xff]   ;;  %v2805_v48 = vld [vmem:[#allocation5 + $0x168] sm:$0xff]  }
  0x33   :  { %v2800_v43 = vld [vmem:[#allocation5 + $0x1b8] sm:$0xff]   ;;  %v2802_v45 = vld [vmem:[#allocation5 + $0x1f0] sm:$0xff]   ;;  %v2806_v49 = vld [vmem:[#allocation5 + $0x1e8] sm:$0xff]  }
  0x34   :  { %2471 = vmatpush3.bf16.msra.mxu0 %v2779_v14  ;;  %1684 = vmatprep.mubr.bf16.mxu0 %v86_v35  ;;  %v2803_v46 = vld [vmem:[#allocation5 + $0x130] sm:$0xff]   ;;  %v2807_v50 = vld [vmem:[#allocation5 + $0x128] sm:$0xff]   ;;  %v2809_v52 = vld [vmem:[#allocation5 + $0x160] sm:$0xff]  }
  0x35   :  { %2493 = vmatpush3.bf16.msra.mxu1 %v2780_v15  ;;  %2472 = vmatprep.subr.bf16.mxu0 %v2781_v16  ;;  %v2804_v47 = vld [vmem:[#allocation5 + $0x1b0] sm:$0xff]   ;;  %v2808_v51 = vld [vmem:[#allocation5 + $0x1a8] sm:$0xff]   ;;  %v2810_v53 = vld [vmem:[#allocation5 + $0x1e0] sm:$0xff]  }
  0x36   :  { %2494 = vmatprep.subr.bf16.mxu1 %v2782_v17  ;;  %v2811_v54 = vld [vmem:[#allocation5 + $0x120] sm:$0xff]   ;;  %v2813_v56 = vld [vmem:[#allocation5 + $0x158] sm:$0xff]   ;;  %v2817_v60 = vld [vmem:[#allocation5 + $0x150] sm:$0xff]  }
  0x37   :  { %v2812_v55 = vld [vmem:[#allocation5 + $0x1a0] sm:$0xff]   ;;  %v2814_v57 = vld [vmem:[#allocation5 + $0x1d8] sm:$0xff]   ;;  %v2818_v61 = vld [vmem:[#allocation5 + $0x1d0] sm:$0xff]  }
  0x38   :  { %2473 = vmatpush3.bf16.msra.mxu0 %v2783_v18  ;;  %v2815_v58 = vld [vmem:[#allocation5 + $0x118] sm:$0xff]   ;;  %v2819_v62 = vld [vmem:[#allocation5 + $0x110] sm:$0xff]   ;;  %v2821_v0 = vld [vmem:[#allocation5 + $0x148] sm:$0xff]  }
  0x39   :  { %2495 = vmatpush3.bf16.msra.mxu1 %v2784_v19  ;;  %2474 = vmatprep.subr.bf16.mxu0 %v2785_v20  ;;  %v2816_v59 = vld [vmem:[#allocation5 + $0x198] sm:$0xff]   ;;  %v2820_v63 = vld [vmem:[#allocation5 + $0x190] sm:$0xff]   ;;  %v2822_v1 = vld [vmem:[#allocation5 + $0x1c8] sm:$0xff]  }
  0x3a   :  { %2496 = vmatprep.subr.bf16.mxu1 %v2786_v21  ;;  %v2823_v2 = vld [vmem:[#allocation5 + $0x108] sm:$0xff]   ;;  %v2825_v4 = vld [vmem:[#allocation5 + $0x140] sm:$0xff]   ;;  %v68_v9 = vld [vmem:[#allocation2 + $0x38] sm:$0xff] }
  0x3b   :  { %v2824_v3 = vld [vmem:[#allocation5 + $0x188] sm:$0xff]   ;;  %v2826_v5 = vld [vmem:[#allocation5 + $0x1c0] sm:$0xff]   ;;  %v92_v11 = vpack.c.bf16 %v68_v9, %v68_v9  ;;  %v67_v13 = vld [vmem:[#allocation2 + $0x30] sm:$0xff] }
  0x3c   :  { %2475 = vmatpush3.bf16.msra.mxu0 %v2787_v22  ;;  %v2827_v6 = vld [vmem:[#allocation5 + $0x100] sm:$0xff]   ;;  %v66_v8 = vld [vmem:[#allocation2 + $0x28] sm:$0xff]  ;;  %v91_v15 = vpack.c.bf16 %v67_v13, %v67_v13  ;;  %v2829_v16 = vld [vmem:[#allocation5 + $0x278] sm:$0xff]  }
  0x3d   :  { %2497 = vmatpush3.bf16.msra.mxu1 %v2788_v23  ;;  %2476 = vmatprep.subr.bf16.mxu0 %v2789_v24  ;;  %v2828_v7 = vld [vmem:[#allocation5 + $0x180] sm:$0xff]   ;;  %v90_v10 = vpack.c.bf16 %v66_v8, %v66_v8  ;;  %v2830_v17 = vld [vmem:[#allocation5 + $0x2f8] sm:$0xff]   ;;  %v2833_v20 = vld [vmem:[#allocation5 + $0x270] sm:$0xff]  }
  0x3e   :  { %2498 = vmatprep.subr.bf16.mxu1 %v2790_v25  ;;  %v65_v12 = vld [vmem:[#allocation2 + $0x20] sm:$0xff]  ;;  %v2831_v18 = vld [vmem:[#allocation5 + $0x238] sm:$0xff]   ;;  %v2834_v21 = vld [vmem:[#allocation5 + $0x2f0] sm:$0xff]  }
  0x3f   :  { %v89_v14 = vpack.c.bf16 %v65_v12, %v65_v12  ;;  %v2832_v19 = vld [vmem:[#allocation5 + $0x2b8] sm:$0xff]   ;;  %v2835_v22 = vld [vmem:[#allocation5 + $0x230] sm:$0xff]   ;;  %v2837_v24 = vld [vmem:[#allocation5 + $0x268] sm:$0xff]  }
  0x40   :  { %2477 = vmatpush3.bf16.msra.mxu0 %v2791_v26  ;;  %v2836_v23 = vld [vmem:[#allocation5 + $0x2b0] sm:$0xff]   ;;  %v2838_v25 = vld [vmem:[#allocation5 + $0x2e8] sm:$0xff]   ;;  %v2845_v32 = vld [vmem:[#allocation5 + $0x258] sm:$0xff]  }
  0x41   :  { %2499 = vmatpush3.bf16.msra.mxu1 %v2792_v27  ;;  %2478 = vmatprep.subr.bf16.mxu0 %v2793_v28  ;;  %v2839_v26 = vld [vmem:[#allocation5 + $0x228] sm:$0xff]   ;;  %v2841_v28 = vld [vmem:[#allocation5 + $0x260] sm:$0xff]   ;;  %v2846_v33 = vld [vmem:[#allocation5 + $0x2d8] sm:$0xff]  }
  0x42   :  { %2500 = vmatprep.subr.bf16.mxu1 %v2794_v29  ;;  %v2840_v27 = vld [vmem:[#allocation5 + $0x2a8] sm:$0xff]   ;;  %v2842_v29 = vld [vmem:[#allocation5 + $0x2e0] sm:$0xff]   ;;  %v2847_v34 = vld [vmem:[#allocation5 + $0x218] sm:$0xff]  }
  0x43   :  { %v2848_v35 = vld [vmem:[#allocation5 + $0x298] sm:$0xff]   ;;  %v2849_v36 = vld [vmem:[#allocation5 + $0x250] sm:$0xff]  }
  0x44   :  { %2479 = vmatpush3.bf16.msra.mxu0 %v2795_v30  ;;  %v2843_v30 = vld [vmem:[#allocation5 + $0x220] sm:$0xff]   ;;  %v2851_v38 = vld [vmem:[#allocation5 + $0x210] sm:$0xff]   ;;  %v2877_v8 = vld [vmem:[#allocation5 + $0x358] sm:$0xff]  }
  0x45   :  { %2501 = vmatpush3.bf16.msra.mxu1 %v2796_v31  ;;  %2508 = vmatprep.subr.bf16.mxu0 %v2797_v40  ;;  %v2844_v31 = vld [vmem:[#allocation5 + $0x2a0] sm:$0xff]   ;;  %v2853_v40 = vld [vmem:[#allocation5 + $0x248] sm:$0xff]   ;;  %v2878_v9 = vld [vmem:[#allocation5 + $0x3d8] sm:$0xff]  }
  0x46   :  { %2530 = vmatprep.subr.bf16.mxu1 %v2798_v41  ;;  %v2854_v41 = vld [vmem:[#allocation5 + $0x2c8] sm:$0xff]   ;;  %v2881_v12 = vld [vmem:[#allocation5 + $0x350] sm:$0xff]  }
  0x47   :  { %1685 = vmatmul.mubr.bf16.vlgmr.msra.gmra.mxu0 %v85_v37  ;;  %v2850_v37 = vld [vmem:[#allocation5 + $0x2d0] sm:$0xff]  }
  0x48   :  { %1725 = vmatmul.mubr.bf16.vlgmr.msra.gmra.mxu1 %v87_v39  ;;  %2509 = vmatpush3.bf16.msra.mxu0 %v2799_v42  ;;  %v2852_v39 = vld [vmem:[#allocation5 + $0x290] sm:$0xff]   ;;  %v2855_v42 = vld [vmem:[#allocation5 + $0x208] sm:$0xff]  }
  0x49   :  { %2531 = vmatpush3.bf16.msra.mxu1 %v2800_v43  ;;  %2510 = vmatprep.subr.bf16.mxu0 %v2801_v44  ;;  %v2856_v43 = vld [vmem:[#allocation5 + $0x288] sm:$0xff]   ;;  %v2857_v44 = vld [vmem:[#allocation5 + $0x240] sm:$0xff]   ;;  %v2882_v13 = vld [vmem:[#allocation5 + $0x3d0] sm:$0xff]  }
  0x4a   :  { %2532 = vmatprep.subr.bf16.mxu1 %v2802_v45  ;;  %1764 = vmatprep.mubr.bf16.mxu0 %v90_v10  ;;  %v2858_v45 = vld [vmem:[#allocation5 + $0x2c0] sm:$0xff]   ;;  %v2879_v10 = vld [vmem:[#allocation5 + $0x318] sm:$0xff]  }
  0x4b   :  { %1804 = vmatprep.mubr.bf16.mxu1 %v92_v11  ;;  %v2880_v11 = vld [vmem:[#allocation5 + $0x398] sm:$0xff]  }
  0x4c   :  { %2511 = vmatpush3.bf16.msra.mxu0 %v2803_v46  ;;  %v2859_v46 = vld [vmem:[#allocation5 + $0x200] sm:$0xff]  }
  0x4d   :  { %2533 = vmatpush3.bf16.msra.mxu1 %v2804_v47  ;;  %2512 = vmatprep.subr.bf16.mxu0 %v2805_v48  ;;  %v2860_v47 = vld [vmem:[#allocation5 + $0x280] sm:$0xff]   ;;  %v70_v48 = vld [vmem:[#allocation2 + $0x48] sm:$0xff] }
  0x4e   :  { %2534 = vmatprep.subr.bf16.mxu1 %v2806_v49  ;;  %v94_v49 = vpack.c.bf16 %v70_v48, %v70_v48  ;;  %v2909_v48 = vld [vmem:[#allocation5 + $0x458] sm:$0xff]  }
  0x50   :  { %2513 = vmatpush3.bf16.msra.mxu0 %v2807_v50  ;;  %v72_v50 = vld [vmem:[#allocation2 + $0x58] sm:$0xff] }
  0x51   :  { %2535 = vmatpush3.bf16.msra.mxu1 %v2808_v51  ;;  %2514 = vmatprep.subr.bf16.mxu0 %v2809_v52  ;;  %v69_v51 = vld [vmem:[#allocation2 + $0x40] sm:$0xff]  ;;  %v71_v52 = vld [vmem:[#allocation2 + $0x50] sm:$0xff] }
  0x52   :  { %2536 = vmatprep.subr.bf16.mxu1 %v2810_v53  ;;  %v96_v53 = vpack.c.bf16 %v72_v50, %v72_v50  ;;  %v2911_v50 = vld [vmem:[#allocation5 + $0x418] sm:$0xff]  }
  0x54   :  { %2515 = vmatpush3.bf16.msra.mxu0 %v2811_v54  ;;  %v93_v54 = vpack.c.bf16 %v69_v51, %v69_v51  ;;  %v2912_v51 = vld [vmem:[#allocation5 + $0x498] sm:$0xff]  }
  0x55   :  { %2537 = vmatpush3.bf16.msra.mxu1 %v2812_v55  ;;  %2516 = vmatprep.subr.bf16.mxu0 %v2813_v56  ;;  %v95_v55 = vpack.c.bf16 %v71_v52, %v71_v52  ;;  %v2861_v56 = vld [vmem:[#allocation5 + $0x378] sm:$0xff]   ;;  %v2913_v52 = vld [vmem:[#allocation5 + $0x450] sm:$0xff]  }
  0x56   :  { %2538 = vmatprep.subr.bf16.mxu1 %v2814_v57  ;;  %v2862_v57 = vld [vmem:[#allocation5 + $0x3f8] sm:$0xff]  }
  0x58   :  { %2517 = vmatpush3.bf16.msra.mxu0 %v2815_v58  ;;  %v2863_v58 = vld [vmem:[#allocation5 + $0x338] sm:$0xff]  }
  0x59   :  { %2539 = vmatpush3.bf16.msra.mxu1 %v2816_v59  ;;  %2518 = vmatprep.subr.bf16.mxu0 %v2817_v60  ;;  %v2864_v59 = vld [vmem:[#allocation5 + $0x3b8] sm:$0xff]   ;;  %v2865_v60 = vld [vmem:[#allocation5 + $0x370] sm:$0xff]  }
  0x5a   :  { %2540 = vmatprep.subr.bf16.mxu1 %v2818_v61  ;;  %v2866_v61 = vld [vmem:[#allocation5 + $0x3f0] sm:$0xff]  }
  0x5c   :  { %2519 = vmatpush3.bf16.msra.mxu0 %v2819_v62  ;;  %v2867_v62 = vld [vmem:[#allocation5 + $0x330] sm:$0xff]  }
  0x5d   :  { %2541 = vmatpush3.bf16.msra.mxu1 %v2820_v63  ;;  %2520 = vmatprep.subr.bf16.mxu0 %v2821_v0  ;;  %v2868_v63 = vld [vmem:[#allocation5 + $0x3b0] sm:$0xff]   ;;  %v2869_v0 = vld [vmem:[#allocation5 + $0x368] sm:$0xff]  }
  0x5e   :  { %2542 = vmatprep.subr.bf16.mxu1 %v2822_v1  ;;  %v2870_v1 = vld [vmem:[#allocation5 + $0x3e8] sm:$0xff]  }
  0x60   :  { %2521 = vmatpush3.bf16.msra.mxu0 %v2823_v2  ;;  %v2871_v2 = vld [vmem:[#allocation5 + $0x328] sm:$0xff]  }
  0x61   :  { %2543 = vmatpush3.bf16.msra.mxu1 %v2824_v3  ;;  %2522 = vmatprep.subr.bf16.mxu0 %v2825_v4  ;;  %v2872_v3 = vld [vmem:[#allocation5 + $0x3a8] sm:$0xff]   ;;  %v2873_v4 = vld [vmem:[#allocation5 + $0x360] sm:$0xff]  }
  0x62   :  { %2544 = vmatprep.subr.bf16.mxu1 %v2826_v5  ;;  %v2874_v5 = vld [vmem:[#allocation5 + $0x3e0] sm:$0xff]  }
  0x64   :  { %2523 = vmatpush3.bf16.msra.mxu0 %v2827_v6  ;;  %v2875_v6 = vld [vmem:[#allocation5 + $0x320] sm:$0xff]  }
  0x65   :  { %2545 = vmatpush3.bf16.msra.mxu1 %v2828_v7  ;;  %2552 = vmatprep.subr.bf16.mxu0 %v2829_v16  ;;  %v2876_v7 = vld [vmem:[#allocation5 + $0x3a0] sm:$0xff]   ;;  %v2885_v16 = vld [vmem:[#allocation5 + $0x348] sm:$0xff]  }
  0x66   :  { %2574 = vmatprep.subr.bf16.mxu1 %v2830_v17  ;;  %v2886_v17 = vld [vmem:[#allocation5 + $0x3c8] sm:$0xff]  }
  0x67   :  { %1765 = vmatmul.mubr.bf16.vlgmr.msra.gmra.mxu0 %v89_v14  ;;  %v2883_v14 = vld [vmem:[#allocation5 + $0x310] sm:$0xff]  }
  0x68   :  { %1805 = vmatmul.mubr.bf16.vlgmr.msra.gmra.mxu1 %v91_v15  ;;  %2553 = vmatpush3.bf16.msra.mxu0 %v2831_v18  ;;  %v2884_v15 = vld [vmem:[#allocation5 + $0x390] sm:$0xff]   ;;  %v2887_v18 = vld [vmem:[#allocation5 + $0x308] sm:$0xff]  }
  0x69   :  { %2575 = vmatpush3.bf16.msra.mxu1 %v2832_v19  ;;  %2554 = vmatprep.subr.bf16.mxu0 %v2833_v20  ;;  %v2888_v19 = vld [vmem:[#allocation5 + $0x388] sm:$0xff]   ;;  %v2889_v20 = vld [vmem:[#allocation5 + $0x340] sm:$0xff]  }
  0x6a   :  { %2576 = vmatprep.subr.bf16.mxu1 %v2834_v21  ;;  %1844 = vmatprep.mubr.bf16.mxu0 %v94_v49  ;;  %v2890_v21 = vld [vmem:[#allocation5 + $0x3c0] sm:$0xff]   ;;  %v2910_v49 = vld [vmem:[#allocation5 + $0x4d8] sm:$0xff]  }
  0x6b   :  { %1884 = vmatprep.mubr.bf16.mxu1 %v96_v53  ;;  %v2914_v53 = vld [vmem:[#allocation5 + $0x4d0] sm:$0xff]  }
  0x6c   :  { %2555 = vmatpush3.bf16.msra.mxu0 %v2835_v22  ;;  %v2891_v22 = vld [vmem:[#allocation5 + $0x300] sm:$0xff]  }
  0x6d   :  { %2577 = vmatpush3.bf16.msra.mxu1 %v2836_v23  ;;  %2556 = vmatprep.subr.bf16.mxu0 %v2837_v24  ;;  %v2892_v23 = vld [vmem:[#allocation5 + $0x380] sm:$0xff]   ;;  %v74_v24 = vld [vmem:[#allocation2 + $0x68] sm:$0xff] }
  0x6e   :  { %2578 = vmatprep.subr.bf16.mxu1 %v2838_v25  ;;  %v76_v25 = vld [vmem:[#allocation2 + $0x78] sm:$0xff] }
  0x70   :  { %2557 = vmatpush3.bf16.msra.mxu0 %v2839_v26  ;;  %v73_v26 = vld [vmem:[#allocation2 + $0x60] sm:$0xff] }
  0x71   :  { %2579 = vmatpush3.bf16.msra.mxu1 %v2840_v27  ;;  %2558 = vmatprep.subr.bf16.mxu0 %v2841_v28  ;;  %v98_v27 = vpack.c.bf16 %v74_v24, %v74_v24  ;;  %v100_v28 = vpack.c.bf16 %v76_v25, %v76_v25  ;;  %v2941_v24 = vld [vmem:[#allocation5 + $0x558] sm:$0xff]  }
  0x72   :  { %2580 = vmatprep.subr.bf16.mxu1 %v2842_v29  ;;  %v97_v29 = vpack.c.bf16 %v73_v26, %v73_v26  ;;  %v2942_v25 = vld [vmem:[#allocation5 + $0x5d8] sm:$0xff]  }
  0x73   :  { %v2943_v26 = vld [vmem:[#allocation5 + $0x518] sm:$0xff]  }
  0x74   :  { %2559 = vmatpush3.bf16.msra.mxu0 %v2843_v30  ;;  %v75_v30 = vld [vmem:[#allocation2 + $0x70] sm:$0xff] }
  0x75   :  { %2581 = vmatpush3.bf16.msra.mxu1 %v2844_v31  ;;  %2560 = vmatprep.subr.bf16.mxu0 %v2845_v32  ;;  %v99_v31 = vpack.c.bf16 %v75_v30, %v75_v30  ;;  %v2893_v32 = vld [vmem:[#allocation5 + $0x478] sm:$0xff]   ;;  %v2947_v30 = vld [vmem:[#allocation5 + $0x510] sm:$0xff]  }
  0x76   :  { %2582 = vmatprep.subr.bf16.mxu1 %v2846_v33  ;;  %v2894_v33 = vld [vmem:[#allocation5 + $0x4f8] sm:$0xff]  }
  0x78   :  { %2561 = vmatpush3.bf16.msra.mxu0 %v2847_v34  ;;  %v2895_v34 = vld [vmem:[#allocation5 + $0x438] sm:$0xff]  }
  0x79   :  { %2583 = vmatpush3.bf16.msra.mxu1 %v2848_v35  ;;  %2562 = vmatprep.subr.bf16.mxu0 %v2849_v36  ;;  %v2896_v35 = vld [vmem:[#allocation5 + $0x4b8] sm:$0xff]   ;;  %v2897_v36 = vld [vmem:[#allocation5 + $0x470] sm:$0xff]  }
  0x7a   :  { %2584 = vmatprep.subr.bf16.mxu1 %v2850_v37  ;;  %v2898_v37 = vld [vmem:[#allocation5 + $0x4f0] sm:$0xff]  }
  0x7c   :  { %2563 = vmatpush3.bf16.msra.mxu0 %v2851_v38  ;;  %v2899_v38 = vld [vmem:[#allocation5 + $0x430] sm:$0xff]  }
  0x7d   :  { %2585 = vmatpush3.bf16.msra.mxu1 %v2852_v39  ;;  %2564 = vmatprep.subr.bf16.mxu0 %v2853_v40  ;;  %v2900_v39 = vld [vmem:[#allocation5 + $0x4b0] sm:$0xff]   ;;  %v2901_v40 = vld [vmem:[#allocation5 + $0x468] sm:$0xff]  }
  0x7e   :  { %2586 = vmatprep.subr.bf16.mxu1 %v2854_v41  ;;  %v2902_v41 = vld [vmem:[#allocation5 + $0x4e8] sm:$0xff]  }
  0x80   :  { %2565 = vmatpush3.bf16.msra.mxu0 %v2855_v42  ;;  %v2903_v42 = vld [vmem:[#allocation5 + $0x428] sm:$0xff]  }
  0x81   :  { %2587 = vmatpush3.bf16.msra.mxu1 %v2856_v43  ;;  %2566 = vmatprep.subr.bf16.mxu0 %v2857_v44  ;;  %v2904_v43 = vld [vmem:[#allocation5 + $0x4a8] sm:$0xff]   ;;  %v2905_v44 = vld [vmem:[#allocation5 + $0x460] sm:$0xff]  }
  0x82   :  { %2588 = vmatprep.subr.bf16.mxu1 %v2858_v45  ;;  %v2906_v45 = vld [vmem:[#allocation5 + $0x4e0] sm:$0xff]  }
  0x84   :  { %2567 = vmatpush3.bf16.msra.mxu0 %v2859_v46  ;;  %v2907_v46 = vld [vmem:[#allocation5 + $0x420] sm:$0xff]  }
  0x85   :  { %2589 = vmatpush3.bf16.msra.mxu1 %v2860_v47  ;;  %2596 = vmatprep.subr.bf16.mxu0 %v2861_v56  ;;  %v2908_v47 = vld [vmem:[#allocation5 + $0x4a0] sm:$0xff]   ;;  %v2917_v56 = vld [vmem:[#allocation5 + $0x448] sm:$0xff]  }
  0x86   :  { %2618 = vmatprep.subr.bf16.mxu1 %v2862_v57  ;;  %v2918_v57 = vld [vmem:[#allocation5 + $0x4c8] sm:$0xff]  }
  0x87   :  { %1845 = vmatmul.mubr.bf16.vlgmr.msra.gmra.mxu0 %v93_v54  ;;  %v2915_v54 = vld [vmem:[#allocation5 + $0x410] sm:$0xff]  }
  0x88   :  { %1885 = vmatmul.mubr.bf16.vlgmr.msra.gmra.mxu1 %v95_v55  ;;  %2597 = vmatpush3.bf16.msra.mxu0 %v2863_v58  ;;  %v2916_v55 = vld [vmem:[#allocation5 + $0x490] sm:$0xff]   ;;  %v2919_v58 = vld [vmem:[#allocation5 + $0x408] sm:$0xff]  }
  0x89   :  { %2619 = vmatpush3.bf16.msra.mxu1 %v2864_v59  ;;  %2598 = vmatprep.subr.bf16.mxu0 %v2865_v60  ;;  %v2920_v59 = vld [vmem:[#allocation5 + $0x488] sm:$0xff]   ;;  %v2921_v60 = vld [vmem:[#allocation5 + $0x440] sm:$0xff]  }
  0x8a   :  { %2620 = vmatprep.subr.bf16.mxu1 %v2866_v61  ;;  %1924 = vmatprep.mubr.bf16.mxu0 %v98_v27  ;;  %v2922_v61 = vld [vmem:[#allocation5 + $0x4c0] sm:$0xff]   ;;  %v2944_v27 = vld [vmem:[#allocation5 + $0x598] sm:$0xff]  }
  0x8b   :  { %1964 = vmatprep.mubr.bf16.mxu1 %v100_v28  ;;  %v2945_v28 = vld [vmem:[#allocation5 + $0x550] sm:$0xff]  }
  0x8c   :  { %2599 = vmatpush3.bf16.msra.mxu0 %v2867_v62  ;;  %v2923_v62 = vld [vmem:[#allocation5 + $0x400] sm:$0xff]  }
  0x8d   :  { %2621 = vmatpush3.bf16.msra.mxu1 %v2868_v63  ;;  %2600 = vmatprep.subr.bf16.mxu0 %v2869_v0  ;;  %v2924_v63 = vld [vmem:[#allocation5 + $0x480] sm:$0xff]   ;;  %v78_v0 = vld [vmem:[#allocation2 + $0x88] sm:$0xff] }
  0x8e   :  { %2622 = vmatprep.subr.bf16.mxu1 %v2870_v1  ;;  %v80_v1 = vld [vmem:[#allocation2 + $0x98] sm:$0xff] }
  0x90   :  { %2601 = vmatpush3.bf16.msra.mxu0 %v2871_v2  ;;  %v102_v2 = vpack.c.bf16 %v78_v0, %v78_v0  ;;  %v2959_v0 = vld [vmem:[#allocation7 + $0x28] sm:$0xff]  }
  0x91   :  { %2623 = vmatpush3.bf16.msra.mxu1 %v2872_v3  ;;  %2602 = vmatprep.subr.bf16.mxu0 %v2873_v4  ;;  %v104_v3 = vpack.c.bf16 %v80_v1, %v80_v1  ;;  %v77_v4 = vld [vmem:[#allocation2 + $0x80] sm:$0xff] }
  0x92   :  { %2624 = vmatprep.subr.bf16.mxu1 %v2874_v5  ;;  %v79_v5 = vld [vmem:[#allocation2 + $0x90] sm:$0xff]  ;;  %v2960_v1 = vld [vmem:[#allocation7 + $0x20] sm:$0xff]  }
  0x94   :  { %2603 = vmatpush3.bf16.msra.mxu0 %v2875_v6  ;;  %v101_v6 = vpack.c.bf16 %v77_v4, %v77_v4 }
  0x95   :  { %2625 = vmatpush3.bf16.msra.mxu1 %v2876_v7  ;;  %2604 = vmatprep.subr.bf16.mxu0 %v2877_v8  ;;  %v103_v7 = vpack.c.bf16 %v79_v5, %v79_v5  ;;  %v2925_v8 = vld [vmem:[#allocation5 + $0x578] sm:$0xff]  }
  0x96   :  { %2626 = vmatprep.subr.bf16.mxu1 %v2878_v9  ;;  %v2926_v9 = vld [vmem:[#allocation5 + $0x5f8] sm:$0xff]  }
  0x98   :  { %2605 = vmatpush3.bf16.msra.mxu0 %v2879_v10  ;;  %v2927_v10 = vld [vmem:[#allocation5 + $0x538] sm:$0xff]  }
  0x99   :  { %2627 = vmatpush3.bf16.msra.mxu1 %v2880_v11  ;;  %2606 = vmatprep.subr.bf16.mxu0 %v2881_v12  ;;  %v2928_v11 = vld [vmem:[#allocation5 + $0x5b8] sm:$0xff]   ;;  %v2929_v12 = vld [vmem:[#allocation5 + $0x570] sm:$0xff]  }
  0x9a   :  { %2628 = vmatprep.subr.bf16.mxu1 %v2882_v13  ;;  %v2930_v13 = vld [vmem:[#allocation5 + $0x5f0] sm:$0xff]  }
  0x9c   :  { %2607 = vmatpush3.bf16.msra.mxu0 %v2883_v14  ;;  %v2931_v14 = vld [vmem:[#allocation5 + $0x530] sm:$0xff]  }
  0x9d   :  { %2629 = vmatpush3.bf16.msra.mxu1 %v2884_v15  ;;  %2608 = vmatprep.subr.bf16.mxu0 %v2885_v16  ;;  %v2932_v15 = vld [vmem:[#allocation5 + $0x5b0] sm:$0xff]   ;;  %v2933_v16 = vld [vmem:[#allocation5 + $0x568] sm:$0xff]  }
  0x9e   :  { %2630 = vmatprep.subr.bf16.mxu1 %v2886_v17  ;;  %v2934_v17 = vld [vmem:[#allocation5 + $0x5e8] sm:$0xff]  }
  0xa0   :  { %2609 = vmatpush3.bf16.msra.mxu0 %v2887_v18  ;;  %v2935_v18 = vld [vmem:[#allocation5 + $0x528] sm:$0xff]  }
  0xa1   :  { %2631 = vmatpush3.bf16.msra.mxu1 %v2888_v19  ;;  %2610 = vmatprep.subr.bf16.mxu0 %v2889_v20  ;;  %v2936_v19 = vld [vmem:[#allocation5 + $0x5a8] sm:$0xff]   ;;  %v2937_v20 = vld [vmem:[#allocation5 + $0x560] sm:$0xff]  }
  0xa2   :  { %2632 = vmatprep.subr.bf16.mxu1 %v2890_v21  ;;  %v2938_v21 = vld [vmem:[#allocation5 + $0x5e0] sm:$0xff]  }
  0xa4   :  { %2611 = vmatpush3.bf16.msra.mxu0 %v2891_v22  ;;  %v2939_v22 = vld [vmem:[#allocation5 + $0x520] sm:$0xff]  }
  0xa5   :  { %2633 = vmatpush3.bf16.msra.mxu1 %v2892_v23  ;;  %2640 = vmatprep.subr.bf16.mxu0 %v2893_v32  ;;  %v2940_v23 = vld [vmem:[#allocation5 + $0x5a0] sm:$0xff]   ;;  %v2949_v32 = vld [vmem:[#allocation5 + $0x548] sm:$0xff]  }
  0xa6   :  { %2662 = vmatprep.subr.bf16.mxu1 %v2894_v33  ;;  %v2950_v33 = vld [vmem:[#allocation5 + $0x5c8] sm:$0xff]  }
  0xa7   :  { %1925 = vmatmul.mubr.bf16.vlgmr.msra.gmra.mxu0 %v97_v29  ;;  %v2946_v29 = vld [vmem:[#allocation5 + $0x5d0] sm:$0xff]  }
  0xa8   :  { %1965 = vmatmul.mubr.bf16.vlgmr.msra.gmra.mxu1 %v99_v31  ;;  %2641 = vmatpush3.bf16.msra.mxu0 %v2895_v34  ;;  %v2948_v31 = vld [vmem:[#allocation5 + $0x590] sm:$0xff]   ;;  %v2951_v34 = vld [vmem:[#allocation5 + $0x508] sm:$0xff]  }
  0xa9   :  { %2663 = vmatpush3.bf16.msra.mxu1 %v2896_v35  ;;  %2642 = vmatprep.subr.bf16.mxu0 %v2897_v36  ;;  %v2952_v35 = vld [vmem:[#allocation5 + $0x588] sm:$0xff]   ;;  %v2953_v36 = vld [vmem:[#allocation5 + $0x540] sm:$0xff]  }
  0xaa   :  { %2664 = vmatprep.subr.bf16.mxu1 %v2898_v37  ;;  %2004 = vmatprep.mubr.bf16.mxu0 %v102_v2  ;;  %v2954_v37 = vld [vmem:[#allocation5 + $0x5c0] sm:$0xff]   ;;  %v2961_v2 = vld [vmem:[#allocation7 + $0x18] sm:$0xff]  }
  0xab   :  { %2044 = vmatprep.mubr.bf16.mxu1 %v104_v3 }
  0xac   :  { %2643 = vmatpush3.bf16.msra.mxu0 %v2899_v38  ;;  %v2955_v38 = vld [vmem:[#allocation5 + $0x500] sm:$0xff]  }
  0xad   :  { %2665 = vmatpush3.bf16.msra.mxu1 %v2900_v39  ;;  %2644 = vmatprep.subr.bf16.mxu0 %v2901_v40  ;;  %v2956_v39 = vld [vmem:[#allocation5 + $0x580] sm:$0xff]   ;;  %v82_v40 = vld [vmem:[#allocation2 + $0xa8] sm:$0xff] }
  0xae   :  { %2666 = vmatprep.subr.bf16.mxu1 %v2902_v41  ;;  %v106_v41 = vpack.c.bf16 %v82_v40, %v82_v40 }
  0xb0   :  { %2645 = vmatpush3.bf16.msra.mxu0 %v2903_v42  ;;  %v84_v42 = vld [vmem:[#allocation2 + $0xb8] sm:$0xff] }
  0xb1   :  { %2667 = vmatpush3.bf16.msra.mxu1 %v2904_v43  ;;  %2646 = vmatprep.subr.bf16.mxu0 %v2905_v44  ;;  %v81_v43 = vld [vmem:[#allocation2 + $0xa0] sm:$0xff]  ;;  %v83_v44 = vld [vmem:[#allocation2 + $0xb0] sm:$0xff] }
  0xb2   :  { %2668 = vmatprep.subr.bf16.mxu1 %v2906_v45  ;;  %v108_v45 = vpack.c.bf16 %v84_v42, %v84_v42 }
  0xb4   :  { %2647 = vmatpush3.bf16.msra.mxu0 %v2907_v46  ;;  %v105_v46 = vpack.c.bf16 %v81_v43, %v81_v43 }
  0xb5   :  { %2669 = vmatpush3.bf16.msra.mxu1 %v2908_v47  ;;  %2648 = vmatprep.subr.bf16.mxu0 %v2909_v48  ;;  %v107_v47 = vpack.c.bf16 %v83_v44, %v83_v44 }
  0xb6   :  { %2670 = vmatprep.subr.bf16.mxu1 %v2910_v49 }
  0xb8   :  { %2649 = vmatpush3.bf16.msra.mxu0 %v2911_v50  ;;  %v2262_v50 = vld [vmem:[%s3109_s2] ss:$0 sm:$0xff] }
  0xb9   :  { %2671 = vmatpush3.bf16.msra.mxu1 %v2912_v51  ;;  %2650 = vmatprep.subr.bf16.mxu0 %v2913_v52 }
  0xba   :  { %2672 = vmatprep.subr.bf16.mxu1 %v2914_v53 }
  0xbc   :  { %2651 = vmatpush3.bf16.msra.mxu0 %v2915_v54 }
  0xbd   :  { %2673 = vmatpush3.bf16.msra.mxu1 %v2916_v55  ;;  %2652 = vmatprep.subr.bf16.mxu0 %v2917_v56 }
  0xbe   :  { %2674 = vmatprep.subr.bf16.mxu1 %v2918_v57 }
  0xc0   :  { %2653 = vmatpush3.bf16.msra.mxu0 %v2919_v58 }
  0xc1   :  { %2675 = vmatpush3.bf16.msra.mxu1 %v2920_v59  ;;  %2654 = vmatprep.subr.bf16.mxu0 %v2921_v60 }
  0xc2   :  { %2676 = vmatprep.subr.bf16.mxu1 %v2922_v61  ;;  %v2957_v61 = vld [vmem:[#allocation7 + $0x38] sm:$0xff]  }
  0xc4   :  { %2655 = vmatpush3.bf16.msra.mxu0 %v2923_v62  ;;  %v3056_v62 = vmov 0.0  }
  0xc5   :  { %2677 = vmatpush3.bf16.msra.mxu1 %v2924_v63  ;;  %2684 = vmatprep.subr.bf16.mxu0 %v2925_v8  ;;  %v2958_v63 = vld [vmem:[#allocation7 + $0x30] sm:$0xff]  }
  0xc6   :  { %2706 = vmatprep.subr.bf16.mxu1 %v2926_v9 }
  0xc7   :  { %2005 = vmatmul.mubr.bf16.vlgmr.msra.gmra.mxu0 %v101_v6 }
  0xc8   :  { %2045 = vmatmul.mubr.bf16.vlgmr.msra.gmra.mxu1 %v103_v7  ;;  %2685 = vmatpush3.bf16.msra.mxu0 %v2927_v10 }
  0xc9   :  { %2707 = vmatpush3.bf16.msra.mxu1 %v2928_v11  ;;  %2686 = vmatprep.subr.bf16.mxu0 %v2929_v12 }
  0xca   :  { %2708 = vmatprep.subr.bf16.mxu1 %v2930_v13  ;;  %2084 = vmatprep.mubr.bf16.mxu0 %v106_v41  ;;  %v2962_v13 = vld [vmem:[#allocation7 + $0x10] sm:$0xff]  }
  0xcb   :  { %2124 = vmatprep.mubr.bf16.mxu1 %v108_v45 }
  0xcc   :  { %2687 = vmatpush3.bf16.msra.mxu0 %v2931_v14 }
  0xcd   :  { %2709 = vmatpush3.bf16.msra.mxu1 %v2932_v15  ;;  %2688 = vmatprep.subr.bf16.mxu0 %v2933_v16  ;;  %v2963_v16 = vld [vmem:[#allocation7 + $0x8] sm:$0xff]  }
  0xce   :  { %2710 = vmatprep.subr.bf16.mxu1 %v2934_v17  ;;  %v2964_v17 = vld [vmem:[#allocation7] sm:$0xff]  }
  0xd0   :  { %2689 = vmatpush3.bf16.msra.mxu0 %v2935_v18 }
  0xd1   :  { %2711 = vmatpush3.bf16.msra.mxu1 %v2936_v19  ;;  %2690 = vmatprep.subr.bf16.mxu0 %v2937_v20 }
  0xd2   :  { %2712 = vmatprep.subr.bf16.mxu1 %v2938_v21 }
  0xd4   :  { %2691 = vmatpush3.bf16.msra.mxu0 %v2939_v22 }
  0xd5   :  { %2713 = vmatpush3.bf16.msra.mxu1 %v2940_v23  ;;  %2692 = vmatprep.subr.bf16.mxu0 %v2941_v24 }
  0xd6   :  { %2714 = vmatprep.subr.bf16.mxu1 %v2942_v25 }
  0xd8   :  { %2693 = vmatpush3.bf16.msra.mxu0 %v2943_v26 }
  0xd9   :  { %2715 = vmatpush3.bf16.msra.mxu1 %v2944_v27  ;;  %2694 = vmatprep.subr.bf16.mxu0 %v2945_v28 }
  0xda   :  { %2716 = vmatprep.subr.bf16.mxu1 %v2946_v29 }
  0xdc   :  { %2695 = vmatpush3.bf16.msra.mxu0 %v2947_v30 }
  0xdd   :  { %2717 = vmatpush3.bf16.msra.mxu1 %v2948_v31  ;;  %2696 = vmatprep.subr.bf16.mxu0 %v2949_v32 }
  0xde   :  { %2718 = vmatprep.subr.bf16.mxu1 %v2950_v33 }
  0xe0   :  { %2697 = vmatpush3.bf16.msra.mxu0 %v2951_v34 }
  0xe1   :  { %2719 = vmatpush3.bf16.msra.mxu1 %v2952_v35  ;;  %2698 = vmatprep.subr.bf16.mxu0 %v2953_v36 }
  0xe2   :  { %2720 = vmatprep.subr.bf16.mxu1 %v2954_v37 }
  0xe4   :  { %2699 = vmatpush3.bf16.msra.mxu0 %v2955_v38 }
  0xe5   :  { %2721 = vmatpush3.bf16.msra.mxu1 %v2956_v39  ;;  %2737 = vmatprep.subr.bf16.mxu0 %v3056_v62 }
  0xe7   :  { %2085 = vmatmul.mubr.bf16.vlgmr.msra.gmra.mxu0 %v105_v46 }
  0xe8   :  { %2125 = vmatmul.mubr.bf16.vlgmr.msra.gmra.mxu1 %v107_v47  ;;  %2738 = vmatpush3.bf16.msra.mxu0 %v2957_v61 }
  0xe9   :  { %2739 = vmatprep.subr.bf16.mxu0 %v3056_v62  ;;  %2753 = vmatprep.mubr.msk.bf16.mxu0 %vm3057_vm0, %v3056_v62 }
  0xec   :  { %2740 = vmatpush3.bf16.msra.mxu0 %v2958_v63 }
  0xed   :  { %2741 = vmatprep.subr.bf16.mxu0 %v3056_v62 }
  0xf0   :  { %2742 = vmatpush3.bf16.msra.mxu0 %v2959_v0 }
  0xf1   :  { %2743 = vmatprep.subr.bf16.mxu0 %v3056_v62 }
  0xf4   :  { %2744 = vmatpush3.bf16.msra.mxu0 %v2960_v1 }
  0xf5   :  { %2745 = vmatprep.subr.bf16.mxu0 %v3056_v62 }
  0xf8   :  { %2746 = vmatpush3.bf16.msra.mxu0 %v2961_v2 }
  0xf9   :  { %2747 = vmatprep.subr.bf16.mxu0 %v3056_v62 }
  0xfc   :  { %2748 = vmatpush3.bf16.msra.mxu0 %v2962_v13 }
  0xfd   :  { %2749 = vmatprep.subr.bf16.mxu0 %v3056_v62 }
 0x100   :  { %2750 = vmatpush3.bf16.msra.mxu0 %v2963_v16 }
 0x101   :  { %2751 = vmatprep.subr.bf16.mxu0 %v3056_v62 }
 0x104   :  { %2752 = vmatpush3.bf16.msra.mxu0 %v2964_v17 }
 0x107   :  { %v2480_v48 = vpop.f32.mrf.mxu0 }
 0x108   :  { %v2502_v49 = vpop.f32.mrf.mxu1 }
 0x109   :  { %v2481_v51 = vpop.f32.mrf.mxu0 }
 0x10a   :  { %v2503_v52 = vpop.f32.mrf.mxu1  ;;  %v2482_v53 = vadd.f32 %v2481_v51, %v2480_v48 }
 0x10b   :  { %v2504_v54 = vadd.f32 %v2503_v52, %v2502_v49  ;;  %v2483_v55 = vpop.f32.mrf.mxu0 }
 0x10c   :  { %v2505_v56 = vpop.f32.mrf.mxu1  ;;  %v1687_v57 = vadd.f32 %v2482_v53, %v2262_v50 }
 0x10d   :  { %v2484_v58 = vpop.f32.mrf.mxu0 }
 0x10e   :  { %v2506_v59 = vpop.f32.mrf.mxu1  ;;  %v1727_v60 = vadd.f32 %v2504_v54, %v1687_v57 }
 0x127   :  { %v2524_v3 = vpop.f32.mrf.mxu0 }
 0x128   :  { %v2546_v4 = vpop.f32.mrf.mxu1 }
 0x129   :  { %v2525_v5 = vpop.f32.mrf.mxu0 }
 0x12a   :  { %v2526_v6 = vadd.f32 %v2525_v5, %v2524_v3  ;;  %v2547_v7 = vpop.f32.mrf.mxu1 }
 0x12b   :  { %v2548_v8 = vadd.f32 %v2547_v7, %v2546_v4  ;;  %v2527_v9 = vpop.f32.mrf.mxu0  ;;  %v2455_v4 = vld [vmem:[%s3111_s4] ss:$0 sm:$0xff] }
 0x12c   :  { %v1767_v10 = vadd.f32 %v2526_v6, %v1727_v60  ;;  %v2549_v11 = vpop.f32.mrf.mxu1 }
 0x12d   :  { %v2528_v12 = vpop.f32.mrf.mxu0 }
 0x12e   :  { %v1807_v14 = vadd.f32 %v2548_v8, %v1767_v10  ;;  %v2550_v15 = vpop.f32.mrf.mxu1 }
 0x147   :  { %v2568_v18 = vpop.f32.mrf.mxu0 }
 0x148   :  { %v2590_v19 = vpop.f32.mrf.mxu1 }
 0x149   :  { %v2569_v20 = vpop.f32.mrf.mxu0 }
 0x14a   :  { %v2570_v21 = vadd.f32 %v2569_v20, %v2568_v18  ;;  %v2591_v22 = vpop.f32.mrf.mxu1 }
 0x14b   :  { %v2592_v23 = vadd.f32 %v2591_v22, %v2590_v19  ;;  %v2571_v24 = vpop.f32.mrf.mxu0 }
 0x14c   :  { %v1847_v25 = vadd.f32 %v2570_v21, %v1807_v14  ;;  %v2593_v26 = vpop.f32.mrf.mxu1 }
 0x14d   :  { %v2572_v27 = vpop.f32.mrf.mxu0 }
 0x14e   :  { %v1887_v28 = vadd.f32 %v2592_v23, %v1847_v25  ;;  %v2594_v29 = vpop.f32.mrf.mxu1 }
 0x167   :  { %v2612_v30 = vpop.f32.mrf.mxu0 }
 0x168   :  { %v2634_v31 = vpop.f32.mrf.mxu1 }
 0x169   :  { %v2613_v32 = vpop.f32.mrf.mxu0 }
 0x16a   :  { %v2635_v33 = vpop.f32.mrf.mxu1  ;;  %v2614_v46 = vadd.f32 %v2613_v32, %v2612_v30 }
 0x16b   :  { %v2615_v34 = vpop.f32.mrf.mxu0  ;;  %v2636_v48 = vadd.f32 %v2635_v33, %v2634_v31 }
 0x16c   :  { %v2637_v35 = vpop.f32.mrf.mxu1  ;;  %v1927_v47 = vadd.f32 %v2614_v46, %v1887_v28 }
 0x16d   :  { %v2616_v36 = vpop.f32.mrf.mxu0 }
 0x16e   :  { %v2638_v37 = vpop.f32.mrf.mxu1  ;;  %v1967_v50 = vadd.f32 %v2636_v48, %v1927_v47 }
 0x187   :  { %v2656_v38 = vpop.f32.mrf.mxu0 }
 0x188   :  { %v2678_v39 = vpop.f32.mrf.mxu1 }
 0x189   :  { %v2657_v40 = vpop.f32.mrf.mxu0 }
 0x18a   :  { %v2679_v41 = vpop.f32.mrf.mxu1  ;;  %v2658_v49 = vadd.f32 %v2657_v40, %v2656_v38 }
 0x18b   :  { %v2659_v42 = vpop.f32.mrf.mxu0  ;;  %v2680_v52 = vadd.f32 %v2679_v41, %v2678_v39 }
 0x18c   :  { %v2681_v43 = vpop.f32.mrf.mxu1  ;;  %v2007_v51 = vadd.f32 %v2658_v49, %v1967_v50 }
 0x18d   :  { %v2660_v44 = vpop.f32.mrf.mxu0 }
 0x18e   :  { %v2682_v45 = vpop.f32.mrf.mxu1  ;;  %v2047_v56 = vadd.f32 %v2680_v52, %v2007_v51 }
 0x1a7   :  { %v2700_v53 = vpop.f32.mrf.mxu0 }
 0x1a8   :  { %v2722_v54 = vpop.f32.mrf.mxu1 }
 0x1a9   :  { %v2701_v55 = vpop.f32.mrf.mxu0 }
 0x1aa   :  { %v2702_v57 = vadd.f32 %v2701_v55, %v2700_v53  ;;  %v2723_v58 = vpop.f32.mrf.mxu1 }
 0x1ab   :  { %v2703_v59 = vpop.f32.mrf.mxu0  ;;  %v2724_v61 = vadd.f32 %v2723_v58, %v2722_v54 }
 0x1ac   :  { %v2087_v60 = vadd.f32 %v2702_v57, %v2047_v56  ;;  %v2725_v62 = vpop.f32.mrf.mxu1 }
 0x1ad   :  { %v2704_v63 = vpop.f32.mrf.mxu0 }
 0x1ae   :  { %v2127_v0 = vadd.f32 %v2724_v61, %v2087_v60  ;;  %v2726_v1 = vpop.f32.mrf.mxu1 }
 0x1b0   :  { %v2132_v2 = vmax.f32 %v2127_v0, 0.0 }
 0x1b2   :  { %v2133_v3 = vpack.c.bf16 %v2132_v2, %v2132_v2 }
 0x1b4   :  { %2754 = vmatmul.mubr.bf16.vlgmr.msra.gmra.mxu0 %v2133_v3 }
 0x274   :  { %v2239_v5 = vpop.f32.mrf.mxu0 }
 0x275   :  { %v2240_v6 = vadd.f32 %v2455_v4, %v2239_v5 }
 0x276   :  { %v2755_v7 = vpop.f32.mrf.mxu0 }
 0x277   :  { %2245 = vst [vmem:[#allocation8] sm:$0xff] %v2240_v6 }
 0x278   :  { %v2242_v8 = vpop.f32.mrf.mxu0 }
 0x279   :  { %3036 = shalt.err (!%p3033_p5)
}
 0x27a   :  { %2255 = dma.vmem_to_hbm [thread:$0]  %s2253_s11, 128, %s3112_s5, [#allocation4]   ;;  %v2756_v9 = vpop.f32.mrf.mxu0 }
 0x27b   :  { %3049 = dma.done.wait [#allocation4], 128  }
 0x27c   :  { %3050 = vsyncadd [#allocation4], 4294967168 }
 0x27d   :  { %2259 = vsyncpa [#allocation3], 1 }
 0x27e   :  { %2260 = vsyncpa [#allocation6], 1 }
 0x27f   :  { %2261 = vsyncpa [#allocation4], 1 }

</bundles_post_ra>
